<compile_context>
chip_gen: v7x
topology: tpu7x:2x2x1
jax: 0.10.0
libtpu: 0.0.40
codegen_flags: <defaults>
</compile_context>

<pallas_src>
import math

import jax
import jax.numpy as jnp
from jax.experimental import pallas as pl
from jax.experimental.pallas import tpu as pltpu


# ----------------------------------------------------------------------------
# Positional table (built once, pre-cast, pre-flattened)
# ----------------------------------------------------------------------------

def build_position_table(encoder_dimension: int, max_len: int = 5000,
                         dtype=jnp.float32) -> jnp.ndarray:
    """Sin/cos table matching the PyTorch buffer (after forward's .squeeze(1)),
    returned pre-cast to the compute dtype and pre-flattened to (1, max_len*D).

    Row-major flatten of a (max_len, D) table: even columns = sin, odd = cos.
    Column-index construction also tolerates odd D (same frequency per pair).
    """
    position = jnp.arange(0, max_len, dtype=jnp.float32)[:, None]        # (L, 1)
    col = jnp.arange(encoder_dimension)                                  # (D,)
    freq = jnp.exp(((col // 2) * 2).astype(jnp.float32)
                   * (-math.log(10000.0) / encoder_dimension))           # (D,)
    angle = position * freq[None, :]                                     # (L, D)
    pe = jnp.where((col % 2) == 0, jnp.sin(angle), jnp.cos(angle))       # (L, D)
    return pe.astype(dtype).reshape(1, max_len * encoder_dimension)


# ----------------------------------------------------------------------------
# Pallas kernel
# ----------------------------------------------------------------------------

_VMEM_BUDGET_BYTES = 8 * 1024 * 1024   # well inside every generation's scoped default
_VMEM_LIMIT_BYTES = 32 * 1024 * 1024   # explicit limit; safe on v5e/v6e/v7x
_MAX_ROW_TILE = 512                    # sublane tile for large batch


def _choose_tiles(n_rows: int, n_cols: int, itemsize: int) -> tuple[int, int]:
    """Row (sublane) and column (lane) tile sizes for the flattened (B, S*D) layout."""
    # Row tile: full batch if small, else 512-row blocks (divisible by 8).
    tr = n_rows if n_rows <= _MAX_ROW_TILE else _MAX_ROW_TILE
    # Double-buffered x-in + out (tr sublanes each) + double-buffered PE (1 sublane).
    bytes_per_col = (4 * tr + 2) * itemsize
    tc = _VMEM_BUDGET_BYTES // max(bytes_per_col, 1)
    # Keep >= ~4 column steps on very wide inputs (pipeline slack, v7x 2-TC
    # sharding), but never drop below 1024 lanes per tile.
    tc = min(tc, max(1024, -(-n_cols // 4)))
    tc = max(128, (tc // 128) * 128)
    if tc >= n_cols:
        tc = n_cols  # full extent is always a legal block shape
    return tr, tc


def _pos_add_kernel(x_ref, pe_ref, o_ref):
    # x_ref / o_ref: (TR, TC); pe_ref: (1, TC). Sublane-broadcast add.
    o_ref[...] = x_ref[...] + pe_ref[...]


def positional_encoder_forward(x: jnp.ndarray, pe_flat: jnp.ndarray) -> jnp.ndarray:
    """x: (B, S, D); pe_flat: (1, max_len*D) from build_position_table.

    Returns x + PE[:S] (broadcast over batch) via a Pallas streaming-add kernel.
    """
    B, S, D = x.shape
    n_cols = S * D
    if pe_flat.ndim != 2 or pe_flat.shape[0] != 1 or pe_flat.shape[1] < n_cols:
        raise ValueError(
            f"pe_flat must be (1, L) with L >= S*D={n_cols}; got {pe_flat.shape}")
    if pe_flat.dtype != x.dtype:
        # Fallback only — pre-build the table in the compute dtype to avoid this cast.
        pe_flat = pe_flat.astype(x.dtype)

    itemsize = jnp.dtype(x.dtype).itemsize
    x2 = x.reshape(B, n_cols)                       # contiguous reshape: free
    tr, tc = _choose_tiles(B, n_cols, itemsize)
    grid = (pl.cdiv(B, tr), pl.cdiv(n_cols, tc))

    out2 = pl.pallas_call(
        _pos_add_kernel,
        out_shape=jax.ShapeDtypeStruct((B, n_cols), x.dtype),
        grid_spec=pltpu.PrefetchScalarGridSpec(
            num_scalar_prefetch=0,
            grid=grid,
            in_specs=[
                pl.BlockSpec((tr, tc), lambda i, j: (i, j)),   # x tile
                pl.BlockSpec((1, tc), lambda i, j: (0, j)),    # PE row tile (only
                                                               # blocks < cdiv(S*D,tc)
                                                               # of the full table)
            ],
            out_specs=pl.BlockSpec((tr, tc), lambda i, j: (i, j)),
        ),
        compiler_params=pltpu.CompilerParams(
            dimension_semantics=("parallel", "parallel"),
            vmem_limit_bytes=_VMEM_LIMIT_BYTES,
        ),
        cost_estimate=pl.CostEstimate(
            flops=B * n_cols,
            transcendentals=0,
            bytes_accessed=(2 * B + 1) * n_cols * itemsize,
        ),
    )(x2, pe_flat)

    return out2.reshape(B, S, D)


def positional_encoder_apply(x: jnp.ndarray, pe_flat: jnp.ndarray,
                             *, min_pallas_bytes: int = 1 << 20) -> jnp.ndarray:
    """Dispatcher: plain fused XLA add for tiny inputs, Pallas kernel otherwise.

    min_pallas_bytes may be raised per generation (especially v7x) if the fused
    XLA broadcast-add already runs at HBM roofline for mid-sized inputs.
    """
    B, S, D = x.shape
    if x.size * jnp.dtype(x.dtype).itemsize < min_pallas_bytes:
        return x + pe_flat[:, :S * D].reshape(1, S, D).astype(x.dtype)
    return positional_encoder_forward(x, pe_flat)


if __name__ == "__main__":
    key = jax.random.PRNGKey(0)
    k1, k2, k3 = jax.random.split(key, 3)

    ok = True

    # --- case 1: small shape matching the module's forward contract ----------
    batch, seq, dim = 2, 8, 32
    max_len = 128  # module default is 5000; only pe[:seq] is ever used.
    pe_flat = build_position_table(dim, max_len=max_len, dtype=jnp.float32)
    pe_2d = pe_flat.reshape(max_len, dim)

    # sanity: row 0 of the table is [0, 1, 0, 1, ...]
    assert jnp.allclose(pe_2d[0, 0::2], 0.0) and jnp.allclose(pe_2d[0, 1::2], 1.0)

    x = jax.random.normal(k1, (batch, seq, dim), dtype=jnp.float32)
    out = jax.block_until_ready(positional_encoder_forward(x, pe_flat))
    ref = x + pe_2d[:seq, :][None, :, :]
    ok &= out.shape == (batch, seq, dim)
    ok &= bool(jnp.allclose(out, ref, atol=1e-6, rtol=1e-6))

    # --- case 2: larger shape exercising a multi-step, lane-dense grid -------
    b2, s2, d2 = 4, 128, 64
    pe_flat2 = build_position_table(d2, max_len=256, dtype=jnp.float32)
    x2 = jax.random.normal(k2, (b2, s2, d2), dtype=jnp.float32)
    out2 = jax.block_until_ready(positional_encoder_forward(x2, pe_flat2))
    ref2 = x2 + pe_flat2.reshape(256, d2)[:s2, :][None, :, :]
    ok &= out2.shape == (b2, s2, d2)
    ok &= bool(jnp.allclose(out2, ref2, atol=1e-6, rtol=1e-6))

    # --- case 3: non-128-aligned columns -> partial edge blocks --------------
    b3, s3, d3 = 3, 100, 48
    pe_flat3 = build_position_table(d3, max_len=128, dtype=jnp.float32)
    x3 = jax.random.normal(k3, (b3, s3, d3), dtype=jnp.float32)
    out3 = jax.block_until_ready(positional_encoder_forward(x3, pe_flat3))
    ref3 = x3 + pe_flat3.reshape(128, d3)[:s3, :][None, :, :]
    ok &= out3.shape == (b3, s3, d3)
    ok &= bool(jnp.allclose(out3, ref3, atol=1e-6, rtol=1e-6))

    # --- dispatcher path (plain XLA add for tiny inputs) ----------------------
    out4 = jax.block_until_ready(positional_encoder_apply(x, pe_flat))
    ok &= bool(jnp.allclose(out4, ref, atol=1e-6, rtol=1e-6))

    if ok:
        print("KERNEL_OK")
</pallas_src>

<mosaic_0001>
module attributes {stable_mosaic.version = 11 : i64} {
  func.func @_pos_add_kernel(%arg0: i32, %arg1: i32, %arg2: memref<2x256xf32, #tpu.memory_space<vmem>>, %arg3: memref<1x256xf32, #tpu.memory_space<vmem>>, %arg4: memref<2x256xf32, #tpu.memory_space<vmem>>) attributes {dimension_semantics = [#tpu.dimension_semantics<parallel>, #tpu.dimension_semantics<parallel>], iteration_bounds = array<i64: 1, 1>, scalar_prefetch = 0 : i64, scratch_operands = 0 : i64, tpu.core_type = #tpu.core_type<tc>, window_params = [{transform_indices = @transform_0, window_bounds = array<i64: 2, 256>}, {transform_indices = @transform_1, window_bounds = array<i64: 1, 256>}, {transform_indices = @transform_2, window_bounds = array<i64: 2, 256>}]} {
    %c0 = arith.constant 0 : index
    %c0_0 = arith.constant 0 : index
    %0 = vector.load %arg2[%c0, %c0_0] : memref<2x256xf32, #tpu.memory_space<vmem>>, vector<2x256xf32>
    %c0_1 = arith.constant 0 : index
    %c0_2 = arith.constant 0 : index
    %1 = vector.load %arg3[%c0_1, %c0_2] : memref<1x256xf32, #tpu.memory_space<vmem>>, vector<1x256xf32>
    %2 = vector.broadcast %1 : vector<1x256xf32> to vector<2x256xf32>
    %3 = arith.addf %0, %2 : vector<2x256xf32>
    %c0_3 = arith.constant 0 : index
    %c0_4 = arith.constant 0 : index
    %4 = vector.load %arg4[%c0_3, %c0_4] : memref<2x256xf32, #tpu.memory_space<vmem>>, vector<2x256xf32>
    tpu.vector_store %arg4[%c0_3, %c0_4], %3 {strides = array<i32>} : memref<2x256xf32, #tpu.memory_space<vmem>>, vector<2x256xf32>,
    return
  }
  func.func @transform_0(%arg0: i32, %arg1: i32) -> (i32, i32) {
    %c0_i32 = arith.constant 0 : i32
    return %arg0, %arg1 : i32, i32
  }
  func.func @transform_1(%arg0: i32, %arg1: i32) -> (i32, i32) {
    %c0_i32 = arith.constant 0 : i32
    %c0_i32_0 = arith.constant 0 : i32
    return %c0_i32, %arg1 : i32, i32
  }
  func.func @transform_2(%arg0: i32, %arg1: i32) -> (i32, i32) {
    %c0_i32 = arith.constant 0 : i32
    return %arg0, %arg1 : i32, i32
  }
}

</mosaic_0001>

<bundles_post_ra>
// kernel: tpu_custom_call.1
= control target key start
LH: loop header
LB: loop body
LE: loop exit
PB: predicated region body
PF: predicated region fallthrough
CT: control target
= control target key end

     0   :  { %7 = vsyncpa [#allocation3], 0  ;;  %s215_s0 = inlined_call_operand.hbm [shape: f32[2,256], index: 0, kind: input, shape index: {}]   ;;  %s216_s1 = inlined_call_operand.hbm [shape: f32[1,4096], index: 1, kind: input, shape index: {}]   ;;  %s217_s2 = inlined_call_operand.hbm [shape: f32[2,256], index: 2, kind: output, shape index: {}]  }
   0x1   :  { %8 = vsyncpa [#allocation6], 0 }
   0x2   :  { %9 = vsyncpa [#allocation4], 0  ;;  %s150_s9 = smov [#allocation2]   ;;  %s151_s11 = smov [#allocation5]  }
   0x3   :  { %s16_s10 = sshll.u32 %s150_s9, 4  ;;  %s26_s12 = sshll.u32 %s151_s11, 4  ;;  %s17_s10 = int_to_ptr.vmem [resolvable:$true] %s16_s10  ;;  %s169_s12 = int_to_ptr.vmem [resolvable:$true] %s26_s12 }
   0x4   :  { %s78_s15 = scalar_lea.hbm %s215_s0, 64 }
   0x5   :  { %p79_p0 = scmp.ne.s32.totalorder %s215_s0, %s78_s15  ;;  %p82_p1 = scmp.lt.u32.totalorder %s78_s15, %s215_s0 }
   0x7   :  { %p84_p2 = pnand %p82_p1, %p79_p0 }
   0x9   :  { %87 = shalt.err (!%p84_p2)
}
   0xa   :  { %s88_s20 = scalar_lea.vmem %s17_s10, 64  ;;  %p93_p4 = scmp.lt.s32.totalorder %s17_s10, %s17_s10 }
   0xb   :  { %p89_p3 = scmp.ne.s32.totalorder %s17_s10, %s88_s20  ;;  %p94_p5 = scmp.lt.s32.totalorder %s88_s20, %s88_s20 }
   0xd   :  { %p95_p6 = por %p94_p5, %p93_p4 }
   0xf   :  { %p96_p7 = pnand %p95_p6, %p89_p3 }
  0x11   :  { %99 = shalt.err (!%p96_p7)
}
  0x12   :  { %19 = dma.hbm_to_vmem [thread:$0]  %s215_s0, 64, %s17_s10, [#allocation3]  }
  0x13   :  { %s100_s25 = scalar_lea.hbm %s216_s1, 32  ;;  %s102_s30 = scalar_lea.hbm %s216_s1, 512 }
  0x14   :  { %p101_p8 = scmp.ne.s32.totalorder %s216_s1, %s100_s25  ;;  %p103_p9 = scmp.lt.u32.totalorder %s102_s30, %s100_s25 }
  0x15   :  { %p104_p10 = scmp.lt.u32.totalorder %s100_s25, %s216_s1 }
  0x17   :  { %p105_p11 = por %p104_p10, %p103_p9 }
  0x19   :  { %p106_p12 = pnand %p105_p11, %p101_p8 }
  0x1b   :  { %109 = shalt.err (!%p106_p12)
}
  0x1c   :  { %s110_s0 = scalar_lea.vmem %s169_s12, 32  ;;  %p115_p0 = scmp.lt.s32.totalorder %s169_s12, %s169_s12 }
  0x1d   :  { %p111_p13 = scmp.ne.s32.totalorder %s169_s12, %s110_s0  ;;  %p116_p1 = scmp.lt.s32.totalorder %s110_s0, %s110_s0 }
  0x1f   :  { %p117_p2 = por %p116_p1, %p115_p0 }
  0x21   :  { %p118_p3 = pnand %p117_p2, %p111_p13 }
  0x23   :  { %121 = shalt.err (!%p118_p3)
}
  0x24   :  { %29 = dma.hbm_to_vmem [thread:$0]  %s216_s1, 32, %s169_s12, [#allocation6]  }
  0x25   :  { %144 = dma.done.wait [#allocation3], 64  }
  0x26   :  { %145 = vsyncadd [#allocation3], 4294967232 }
  0x27   :  { %146 = dma.done.wait [#allocation6], 32  }
  0x28   :  { %147 = vsyncadd [#allocation6], 4294967264  ;;  %v39_v0 = vlaneseq  ;;  %v152_v1 = vmov 1983009808   ;;  %v37_v7 = vld [vmem:[#allocation5] sm:$0x3] }
  0x29   :  { %v49_v2 = vunpack.c.l.s4 %v152_v1  ;;  %v36_v12 = vld [vmem:[#allocation2] sm:$0xf]  ;;  %s153_s7 = smov [#allocation7]  }
  0x2a   :  { %v40_v3 = vshrl.u32 %v39_v0, 7  ;;  %s64_s8 = sshll.u32 %s153_s7, 4  ;;  %s65_s8 = int_to_ptr.vmem [resolvable:$true] %s64_s8 }
  0x2b   :  { %v50_v6 = vunpack.c.0.s8 %v49_v2  ;;  %s122_s1 = scalar_lea.vmem %s65_s8, 64  ;;  %p127_p5 = scmp.lt.s32.totalorder %s65_s8, %s65_s8 }
  0x2c   :  { %v41_v4 = vsub.s32 0, %v40_v3  ;;  %v45_v5 = vsub.s32 1, %v40_v3  ;;  %p123_p4 = scmp.ne.s32.totalorder %s65_s8, %s122_s1  ;;  %p128_p6 = scmp.lt.s32.totalorder %s122_s1, %s122_s1 }
  0x2d   :  { %v53_v10 = vsub.s32 %v50_v6, %v40_v3 }
  0x2e   :  { %v42_v8 = vrot.slane %v37_v7, %v41_v4  ;;  %v46_v9 = vrot.slane %v37_v7, %v45_v5  ;;  %p129_p7 = por %p128_p6, %p127_p5 }
  0x30   :  { %v47_v11 = vcombine.low %v42_v8, %v46_v9  ;;  %p130_p8 = pnand %p129_p7, %p123_p4 }
  0x32   :  { %v54_v13 = vrot.slane %v47_v11, %v53_v10 }
  0x34   :  { %v56_v14 = vadd.f32 %v54_v13, %v36_v12 }
  0x36   :  { %57 = vst [vmem:[#allocation7] sm:$0xf] %v56_v14 }
  0x37   :  { %133 = shalt.err (!%p130_p8)
}
  0x38   :  { %s134_s11 = scalar_lea.hbm %s217_s2, 64 }
  0x39   :  { %p135_p9 = scmp.ne.s32.totalorder %s217_s2, %s134_s11  ;;  %p138_p10 = scmp.lt.u32.totalorder %s134_s11, %s217_s2 }
  0x3b   :  { %p140_p11 = pnand %p138_p10, %p135_p9 }
  0x3d   :  { %143 = shalt.err (!%p140_p11)
}
  0x3e   :  { %67 = dma.vmem_to_hbm [thread:$0]  %s65_s8, 64, %s217_s2, [#allocation4]  }
  0x3f   :  { %148 = dma.done.wait [#allocation4], 64  }
  0x40   :  { %149 = vsyncadd [#allocation4], 4294967232 }
  0x41   :  { %71 = vsyncpa [#allocation3], 1 }
  0x42   :  { %72 = vsyncpa [#allocation6], 1 }
  0x43   :  { %73 = vsyncpa [#allocation4], 1 }

</bundles_post_ra>
